<compile_context>
chip_gen: v7x
topology: tpu7x:2x2x1
jax: 0.10.0
libtpu: 0.0.40
codegen_flags: <defaults>
</compile_context>

<pallas_src>
import functools

import jax
import jax.numpy as jnp
from jax import lax
from jax.experimental import pallas as pl
from jax.experimental.pallas import tpu as pltpu

_LANE = 128
_SUBLANE = 8


def _round_up(x, m):
    return ((x + m - 1) // m) * m


def _class_loss_kernel(rois_t_ref, gt_ref, gt_cat_ref, cls_t_ref,
                       loss_ref, cnt_ref, sum_acc, cnt_acc,
                       *, n_rois, n_gt, n_classes, threshold, tile_n):
    pid = pl.program_id(0)

    @pl.when(pid == 0)
    def _init():
        sum_acc[...] = jnp.zeros_like(sum_acc)
        cnt_acc[...] = jnp.zeros_like(cnt_acc)

    rois_t = rois_t_ref[...]      # (4, TN)      roi coords, rois on lanes
    gt = gt_ref[...]              # (M_pad, 4)   gt boxes, gt on sublanes
    gt_cat = gt_cat_ref[...]      # (M_pad, 1)   int32 gt categories
    cls_t = cls_t_ref[...]        # (C_pad, TN)  class logits, rois on lanes

    m_pad = gt.shape[0]
    c_pad = cls_t.shape[0]

    # roi coords as lane-dense (1, TN) rows
    rx1 = rois_t[0:1, :]
    ry1 = rois_t[1:2, :]
    rx2 = rois_t[2:3, :]
    ry2 = rois_t[3:4, :]

    # gt coords as (M_pad, 1) sublane columns
    gx1 = gt[:, 0:1]
    gy1 = gt[:, 1:2]
    gx2 = gt[:, 2:3]
    gy2 = gt[:, 3:4]

    # pairwise intersection / union (SSD-style jaccard: clamp at 0, no +1) -> (M_pad, TN)
    iw = jnp.maximum(jnp.minimum(rx2, gx2) - jnp.maximum(rx1, gx1), 0.0)
    ih = jnp.maximum(jnp.minimum(ry2, gy2) - jnp.maximum(ry1, gy1), 0.0)
    inter = iw * ih
    area_a = (rx2 - rx1) * (ry2 - ry1)          # (1, TN)
    area_b = (gx2 - gx1) * (gy2 - gy1)          # (M_pad, 1)
    union = area_a + area_b - inter             # (M_pad, TN)

    # divide on the EUP (approx reciprocal) + one Newton step -> ~exact, VALU-free
    r = pl.reciprocal(union, approx=True)
    r = r * (2.0 - union * r)
    iou = inter * r                             # (M_pad, TN)

    m_iota = lax.broadcasted_iota(jnp.int32, (m_pad, tile_n), 0)
    iou = jnp.where(m_iota < n_gt, iou, -1.0)   # kill padded gt rows

    max_iou = jnp.max(iou, axis=0, keepdims=True)                         # (1, TN)
    # first index attaining the max (matches torch argmax tie-break)
    m_iota_f = m_iota.astype(jnp.float32)
    idx_f = jnp.min(jnp.where(iou == max_iou, m_iota_f, float(m_pad)),
                    axis=0, keepdims=True)                                # (1, TN)
    matched_f = jnp.sum(jnp.where(m_iota_f == idx_f,
                                  gt_cat.astype(jnp.float32), 0.0),
                        axis=0, keepdims=True)                            # (1, TN)
    matched = matched_f.astype(jnp.int32)

    # roi selection mask: above threshold and inside the un-padded N range
    lane = lax.broadcasted_iota(jnp.int32, (1, tile_n), 1)
    global_n = pid * tile_n + lane
    mask = (max_iou > threshold) & (global_n < n_rois)                    # (1, TN)

    # per-roi cross-entropy: classes on sublanes, rois on lanes
    c_iota = lax.broadcasted_iota(jnp.int32, (c_pad, tile_n), 0)
    logits = jnp.where(c_iota < n_classes, cls_t, -1e30)                  # mask pad classes
    mx = jnp.max(logits, axis=0, keepdims=True)                           # (1, TN)
    lse = mx + jnp.log(jnp.sum(jnp.exp(logits - mx), axis=0, keepdims=True))
    sel = jnp.sum(jnp.where(c_iota == matched, logits, 0.0),
                  axis=0, keepdims=True)
    ce = lse - sel                                                        # (1, TN)

    sum_acc[...] += jnp.where(mask, ce, 0.0)
    cnt_acc[...] += mask.astype(jnp.float32)

    @pl.when(pid == pl.num_programs(0) - 1)
    def _finalize():
        total = jnp.sum(sum_acc[...])
        cnt = jnp.sum(cnt_acc[...])
        # TODO(synk): the PyTorch module returns (None, None, None) when no roi is
        # matched (and has a debug-print branch for loss > 10); here we emit loss=0
        # with count=0 and let the caller check the count.
        loss_ref[0, 0] = jnp.where(cnt > 0.0, total / cnt, 0.0)
        cnt_ref[0, 0] = cnt


def _choose_tile_n(n_lane, c_pad):
    # Keep double-buffered per-step inputs comfortably under the scoped VMEM limit on
    # every chip (v7x: 64 MiB physical / 32 MiB scoped): budget ~8 MiB for the
    # (4, TN) rois + (C_pad, TN) logits blocks x 2 pipeline buffers.
    bytes_per_roi = (c_pad + 4) * 4 * 2
    tn = (8 * 1024 * 1024) // max(bytes_per_roi, 1)
    tn = max(_LANE, min(4096, (tn // _LANE) * _LANE))
    return min(tn, n_lane)


@functools.partial(jax.jit, static_argnames=("overlap_threshold",))
def _ubr_class_loss_impl(rois, gt_box, class_pred, gt_categories, *, overlap_threshold):
    n = rois.shape[0]
    m = gt_box.shape[0]
    c = class_pred.shape[1]

    m_pad = _round_up(max(m, 1), _SUBLANE)
    c_pad = _round_up(max(c, 1), _SUBLANE)
    n_lane = _round_up(max(n, 1), _LANE)
    tile_n = _choose_tile_n(n_lane, c_pad)
    n_pad = _round_up(n_lane, tile_n)
    grid = n_pad // tile_n

    # Layout prep (pads + transposes) stays inside this jit so it fuses next to the
    # pallas custom call instead of being separate host-side HBM round trips.
    rois_t = jnp.pad(rois.astype(jnp.float32), ((0, n_pad - n), (0, 0))).T         # (4, N_pad)
    cls_t = jnp.pad(class_pred.astype(jnp.float32),
                    ((0, n_pad - n), (0, c_pad - c))).T                             # (C_pad, N_pad)
    gt_p = jnp.pad(gt_box.astype(jnp.float32), ((0, m_pad - m), (0, 0)))            # (M_pad, 4)
    gt_cat_p = jnp.pad(gt_categories.reshape(-1).astype(jnp.int32),
                       ((0, m_pad - m),)).reshape(m_pad, 1)                         # (M_pad, 1)

    kernel = functools.partial(
        _class_loss_kernel, n_rois=n, n_gt=m, n_classes=c,
        threshold=float(overlap_threshold), tile_n=tile_n)

    loss, cnt = pl.pallas_call(
        kernel,
        out_shape=(jax.ShapeDtypeStruct((1, 1), jnp.float32),
                   jax.ShapeDtypeStruct((1, 1), jnp.float32)),
        grid_spec=pltpu.PrefetchScalarGridSpec(
            num_scalar_prefetch=0,
            grid=(grid,),
            in_specs=[
                pl.BlockSpec((4, tile_n), lambda i: (0, i)),       # rois (transposed)
                pl.BlockSpec((m_pad, 4), lambda i: (0, 0)),        # gt boxes
                pl.BlockSpec((m_pad, 1), lambda i: (0, 0)),        # gt categories
                pl.BlockSpec((c_pad, tile_n), lambda i: (0, i)),   # class logits (transposed)
            ],
            out_specs=(
                pl.BlockSpec((1, 1), lambda i: (0, 0),
                             memory_space=pltpu.MemorySpace.SMEM),
                pl.BlockSpec((1, 1), lambda i: (0, 0),
                             memory_space=pltpu.MemorySpace.SMEM),
            ),
            scratch_shapes=[pltpu.VMEM((1, tile_n), jnp.float32),   # running |ce| sum
                            pltpu.VMEM((1, tile_n), jnp.float32)],  # running match count
        ),
        compiler_params=pltpu.CompilerParams(
            dimension_semantics=("arbitrary",),
            vmem_limit_bytes=32 * 1024 * 1024),
    )(rois_t, gt_p, gt_cat_p, cls_t)
    return loss[0, 0], cnt[0, 0]


def ubr_class_loss(rois, gt_box, class_pred, gt_categories, overlap_threshold=0.5):
    """Mirrors UBR_ClassLoss.forward; returns (loss, num_matched, num_rois)."""
    loss, cnt = _ubr_class_loss_impl(rois, gt_box, class_pred, gt_categories,
                                     overlap_threshold=overlap_threshold)
    return loss, cnt.astype(jnp.int32), rois.shape[0]


def _reference(rois, gt_box, class_pred, gt_categories, threshold):
    """Pure-JAX mirror of the PyTorch module (masked-mean cross entropy)."""
    rois = rois.astype(jnp.float32)
    gt_box = gt_box.astype(jnp.float32)
    class_pred = class_pred.astype(jnp.float32)
    rx1, ry1, rx2, ry2 = (rois[:, i:i + 1] for i in range(4))
    gx1, gy1, gx2, gy2 = (gt_box[:, i][None, :] for i in range(4))
    iw = jnp.maximum(jnp.minimum(rx2, gx2) - jnp.maximum(rx1, gx1), 0.0)
    ih = jnp.maximum(jnp.minimum(ry2, gy2) - jnp.maximum(ry1, gy1), 0.0)
    inter = iw * ih
    area_a = (rx2 - rx1) * (ry2 - ry1)
    area_b = (gx2 - gx1) * (gy2 - gy1)
    iou = inter / (area_a + area_b - inter)
    max_iou = jnp.max(iou, axis=1)
    max_idx = jnp.argmax(iou, axis=1)
    mask = max_iou > threshold
    matched = gt_categories.reshape(-1)[max_idx].astype(jnp.int32)      # (N,)
    lse = jax.nn.logsumexp(class_pred, axis=1)
    sel = jnp.take_along_axis(class_pred, matched[:, None], axis=1)[:, 0]
    ce = lse - sel
    cnt = jnp.sum(mask.astype(jnp.int32))
    loss = jnp.sum(jnp.where(mask, ce, 0.0)) / jnp.maximum(cnt, 1).astype(jnp.float32)
    return loss, cnt


if __name__ == "__main__":
    key = jax.random.PRNGKey(0)
    k1, k2, k3, k4, k5, k6, k7 = jax.random.split(key, 7)

    N, M, C = 32, 5, 12        # num rois, num gt boxes, num categories
    threshold = 0.3

    # Deterministic synthetic [x1, y1, x2, y2] boxes with x2 > x1, y2 > y1.
    gt_xy = jax.random.uniform(k1, (M, 2), minval=0.0, maxval=100.0)
    gt_wh = jax.random.uniform(k2, (M, 2), minval=20.0, maxval=60.0)
    gt_box = jnp.concatenate([gt_xy, gt_xy + gt_wh], axis=1)               # (M, 4)

    # First M rois are jittered GT boxes (guaranteed matches above threshold),
    # the remaining rois are random (mostly unmatched).
    rois_hi = gt_box + jax.random.uniform(k3, (M, 4), minval=-2.0, maxval=2.0)
    roi_xy = jax.random.uniform(k4, (N - M, 2), minval=0.0, maxval=100.0)
    roi_wh = jax.random.uniform(k5, (N - M, 2), minval=10.0, maxval=50.0)
    rois_lo = jnp.concatenate([roi_xy, roi_xy + roi_wh], axis=1)
    rois = jnp.concatenate([rois_hi, rois_lo], axis=0)                     # (N, 4)

    gt_categories = jax.random.randint(k6, (M,), 0, C)                     # (M,)
    class_pred = jax.random.normal(k7, (N, C), dtype=jnp.float32)          # (N, C)

    loss, n_matched, n_rois = ubr_class_loss(rois, gt_box, class_pred, gt_categories,
                                             overlap_threshold=threshold)
    loss = jax.block_until_ready(loss)

    ref_loss, ref_cnt = _reference(rois, gt_box, class_pred, gt_categories, threshold)
    assert int(ref_cnt) > 0
    assert int(n_matched) == int(ref_cnt), (int(n_matched), int(ref_cnt))
    assert jnp.allclose(loss, ref_loss, atol=1e-4, rtol=1e-4), (loss, ref_loss)
    assert n_rois == N
    print("KERNEL_OK")
</pallas_src>

<mosaic_0001>
module attributes {stable_mosaic.version = 11 : i64} {
  func.func @_class_loss_kernel(%arg0: i32, %arg1: memref<4x128xf32, #tpu.memory_space<vmem>>, %arg2: memref<8x4xf32, #tpu.memory_space<vmem>>, %arg3: memref<8x1xi32, #tpu.memory_space<vmem>>, %arg4: memref<16x128xf32, #tpu.memory_space<vmem>>, %arg5: memref<1x1xf32, #tpu.memory_space<smem>>, %arg6: memref<1x1xf32, #tpu.memory_space<smem>>, %arg7: memref<1x128xf32, #tpu.memory_space<vmem>>, %arg8: memref<1x128xf32, #tpu.memory_space<vmem>>) attributes {dimension_semantics = [#tpu.dimension_semantics<arbitrary>], iteration_bounds = array<i64: 1>, scalar_prefetch = 0 : i64, scratch_operands = 2 : i64, tpu.core_type = #tpu.core_type<tc>, window_params = [{transform_indices = @transform_0, window_bounds = array<i64: 4, 128>}, {pipeline_mode = #tpu.pipeline_mode<synchronous>, transform_indices = @transform_1, window_bounds = array<i64: 8, 4>}, {pipeline_mode = #tpu.pipeline_mode<synchronous>, transform_indices = @transform_2, window_bounds = array<i64: 8, 1>}, {transform_indices = @transform_3, window_bounds = array<i64: 16, 128>}, {transform_indices = @transform_4, window_bounds = array<i64: 1, 1>}, {transform_indices = @transform_5, window_bounds = array<i64: 1, 1>}]} {
    %c0_i32 = arith.constant 0 : i32
    %0 = arith.cmpi eq, %arg0, %c0_i32 : i32
    %1 = arith.extui %0 : i1 to i32
    %c0_i32_0 = arith.constant 0 : i32
    %2 = arith.cmpi ne, %1, %c0_i32_0 : i32
    scf.if %2 {
      %cst_33 = arith.constant 0.000000e+00 : f32
      %117 = vector.broadcast %cst_33 : f32 to vector<1x128xf32>
      %c0_34 = arith.constant 0 : index
      %c0_35 = arith.constant 0 : index
      %118 = vector.load %arg7[%c0_34, %c0_35] : memref<1x128xf32, #tpu.memory_space<vmem>>, vector<1x128xf32>
      tpu.vector_store %arg7[%c0_34, %c0_35], %117 {strides = array<i32>} : memref<1x128xf32, #tpu.memory_space<vmem>>, vector<1x128xf32>,
      %cst_36 = arith.constant 0.000000e+00 : f32
      %119 = vector.broadcast %cst_36 : f32 to vector<1x128xf32>
      %c0_37 = arith.constant 0 : index
      %c0_38 = arith.constant 0 : index
      %120 = vector.load %arg8[%c0_37, %c0_38] : memref<1x128xf32, #tpu.memory_space<vmem>>, vector<1x128xf32>
      tpu.vector_store %arg8[%c0_37, %c0_38], %119 {strides = array<i32>} : memref<1x128xf32, #tpu.memory_space<vmem>>, vector<1x128xf32>,
    } else {
    }
    %c0 = arith.constant 0 : index
    %c0_1 = arith.constant 0 : index
    %3 = vector.load %arg1[%c0, %c0_1] : memref<4x128xf32, #tpu.memory_space<vmem>>, vector<4x128xf32>
    %c0_2 = arith.constant 0 : index
    %c0_3 = arith.constant 0 : index
    %4 = vector.load %arg2[%c0_2, %c0_3] : memref<8x4xf32, #tpu.memory_space<vmem>>, vector<8x4xf32>
    %c0_4 = arith.constant 0 : index
    %c0_5 = arith.constant 0 : index
    %5 = vector.load %arg3[%c0_4, %c0_5] : memref<8x1xi32, #tpu.memory_space<vmem>>, vector<8x1xi32>
    %c0_6 = arith.constant 0 : index
    %c0_7 = arith.constant 0 : index
    %6 = vector.load %arg4[%c0_6, %c0_7] : memref<16x128xf32, #tpu.memory_space<vmem>>, vector<16x128xf32>
    %7 = vector.extract_strided_slice %3 {offsets = [0, 0], sizes = [1, 128], strides = [1, 1]} : vector<4x128xf32> to vector<1x128xf32>
    %8 = vector.extract_strided_slice %3 {offsets = [1, 0], sizes = [1, 128], strides = [1, 1]} : vector<4x128xf32> to vector<1x128xf32>
    %9 = vector.extract_strided_slice %3 {offsets = [2, 0], sizes = [1, 128], strides = [1, 1]} : vector<4x128xf32> to vector<1x128xf32>
    %10 = vector.extract_strided_slice %3 {offsets = [3, 0], sizes = [1, 128], strides = [1, 1]} : vector<4x128xf32> to vector<1x128xf32>
    %11 = vector.extract_strided_slice %4 {offsets = [0, 0], sizes = [8, 1], strides = [1, 1]} : vector<8x4xf32> to vector<8x1xf32>
    %12 = vector.extract_strided_slice %4 {offsets = [0, 1], sizes = [8, 1], strides = [1, 1]} : vector<8x4xf32> to vector<8x1xf32>
    %13 = vector.extract_strided_slice %4 {offsets = [0, 2], sizes = [8, 1], strides = [1, 1]} : vector<8x4xf32> to vector<8x1xf32>
    %14 = vector.extract_strided_slice %4 {offsets = [0, 3], sizes = [8, 1], strides = [1, 1]} : vector<8x4xf32> to vector<8x1xf32>
    %15 = vector.broadcast %9 : vector<1x128xf32> to vector<8x128xf32>
    %16 = vector.broadcast %13 : vector<8x1xf32> to vector<8x128xf32>
    %17 = arith.minimumf %15, %16 : vector<8x128xf32>
    %18 = vector.broadcast %7 : vector<1x128xf32> to vector<8x128xf32>
    %19 = vector.broadcast %11 : vector<8x1xf32> to vector<8x128xf32>
    %20 = arith.maximumf %18, %19 : vector<8x128xf32>
    %21 = arith.subf %17, %20 : vector<8x128xf32>
    %cst = arith.constant 0.000000e+00 : f32
    %22 = vector.broadcast %cst : f32 to vector<8x128xf32>
    %23 = arith.maximumf %21, %22 : vector<8x128xf32>
    %24 = vector.broadcast %10 : vector<1x128xf32> to vector<8x128xf32>
    %25 = vector.broadcast %14 : vector<8x1xf32> to vector<8x128xf32>
    %26 = arith.minimumf %24, %25 : vector<8x128xf32>
    %27 = vector.broadcast %8 : vector<1x128xf32> to vector<8x128xf32>
    %28 = vector.broadcast %12 : vector<8x1xf32> to vector<8x128xf32>
    %29 = arith.maximumf %27, %28 : vector<8x128xf32>
    %30 = arith.subf %26, %29 : vector<8x128xf32>
    %cst_8 = arith.constant 0.000000e+00 : f32
    %31 = vector.broadcast %cst_8 : f32 to vector<8x128xf32>
    %32 = arith.maximumf %30, %31 : vector<8x128xf32>
    %33 = arith.mulf %23, %32 : vector<8x128xf32>
    %34 = arith.subf %9, %7 : vector<1x128xf32>
    %35 = arith.subf %10, %8 : vector<1x128xf32>
    %36 = arith.mulf %34, %35 : vector<1x128xf32>
    %37 = arith.subf %13, %11 : vector<8x1xf32>
    %38 = arith.subf %14, %12 : vector<8x1xf32>
    %39 = arith.mulf %37, %38 : vector<8x1xf32>
    %40 = vector.broadcast %36 : vector<1x128xf32> to vector<8x128xf32>
    %41 = vector.broadcast %39 : vector<8x1xf32> to vector<8x128xf32>
    %42 = arith.addf %40, %41 : vector<8x128xf32>
    %43 = arith.subf %42, %33 : vector<8x128xf32>
    %44 = tpu.reciprocal %43 {approx = true} : vector<8x128xf32> -> vector<8x128xf32>
    %45 = arith.mulf %43, %44 : vector<8x128xf32>
    %cst_9 = arith.constant 2.000000e+00 : f32
    %46 = vector.broadcast %cst_9 : f32 to vector<8x128xf32>
    %47 = arith.subf %46, %45 : vector<8x128xf32>
    %48 = arith.mulf %44, %47 : vector<8x128xf32>
    %49 = arith.mulf %33, %48 : vector<8x128xf32>
    %50 = tpu.iota {dimensions = array<i32: 0>} : vector<8x128xi32>
    %c5_i32 = arith.constant 5 : i32
    %51 = vector.broadcast %c5_i32 : i32 to vector<8x128xi32>
    %52 = arith.cmpi slt, %50, %51 : vector<8x128xi32>
    %cst_10 = arith.constant -1.000000e+00 : f32
    %53 = vector.broadcast %cst_10 : f32 to vector<8x128xf32>
    %54 = arith.select %52, %49, %53 : vector<8x128xi1>, vector<8x128xf32>
    %cst_11 = arith.constant dense<0xFF800000> : vector<128xf32>
    %55 = vector.multi_reduction <maximumf>, %54, %cst_11 [0] : vector<8x128xf32> to vector<128xf32>
    %56 = vector.shape_cast %55 : vector<128xf32> to vector<1x128xf32>
    %57 = arith.sitofp %50 : vector<8x128xi32> to vector<8x128xf32>
    %58 = vector.broadcast %56 : vector<1x128xf32> to vector<8x128xf32>
    %59 = arith.cmpf oeq, %54, %58 : vector<8x128xf32>
    %cst_12 = arith.constant 8.000000e+00 : f32
    %60 = vector.broadcast %cst_12 : f32 to vector<8x128xf32>
    %61 = arith.select %59, %57, %60 : vector<8x128xi1>, vector<8x128xf32>
    %cst_13 = arith.constant dense<0x7F800000> : vector<128xf32>
    %62 = vector.multi_reduction <minimumf>, %61, %cst_13 [0] : vector<8x128xf32> to vector<128xf32>
    %63 = vector.shape_cast %62 : vector<128xf32> to vector<1x128xf32>
    %64 = vector.broadcast %63 : vector<1x128xf32> to vector<8x128xf32>
    %65 = arith.cmpf oeq, %57, %64 : vector<8x128xf32>
    %66 = arith.sitofp %5 : vector<8x1xi32> to vector<8x1xf32>
    %cst_14 = arith.constant 0.000000e+00 : f32
    %67 = vector.shape_cast %66 : vector<8x1xf32> to vector<8x1xf32>
    %68 = vector.broadcast %67 : vector<8x1xf32> to vector<8x128xf32>
    %69 = vector.broadcast %cst_14 : f32 to vector<8x128xf32>
    %70 = arith.select %65, %68, %69 : vector<8x128xi1>, vector<8x128xf32>
    %cst_15 = arith.constant dense<0.000000e+00> : vector<128xf32>
    %71 = vector.multi_reduction <add>, %70, %cst_15 [0] : vector<8x128xf32> to vector<128xf32>
    %72 = vector.shape_cast %71 : vector<128xf32> to vector<1x128xf32>
    %73 = arith.fptosi %72 : vector<1x128xf32> to vector<1x128xi32>
    %74 = tpu.iota {dimensions = array<i32: 1>} : vector<1x128xi32>
    %c128_i32 = arith.constant 128 : i32
    %75 = arith.muli %arg0, %c128_i32 : i32
    %76 = vector.broadcast %75 : i32 to vector<1x128xi32>
    %77 = arith.addi %76, %74 : vector<1x128xi32>
    %cst_16 = arith.constant 3.000000e-01 : f32
    %78 = vector.broadcast %cst_16 : f32 to vector<1x128xf32>
    %79 = arith.cmpf ogt, %56, %78 : vector<1x128xf32>
    %c32_i32 = arith.constant 32 : i32
    %80 = vector.broadcast %c32_i32 : i32 to vector<1x128xi32>
    %81 = arith.cmpi slt, %77, %80 : vector<1x128xi32>
    %82 = arith.andi %79, %81 : vector<1x128xi1>
    %83 = tpu.iota {dimensions = array<i32: 0>} : vector<16x128xi32>
    %c12_i32 = arith.constant 12 : i32
    %84 = vector.broadcast %c12_i32 : i32 to vector<16x128xi32>
    %85 = arith.cmpi slt, %83, %84 : vector<16x128xi32>
    %cst_17 = arith.constant -1.000000e+30 : f32
    %86 = vector.broadcast %cst_17 : f32 to vector<16x128xf32>
    %87 = arith.select %85, %6, %86 : vector<16x128xi1>, vector<16x128xf32>
    %cst_18 = arith.constant dense<0xFF800000> : vector<128xf32>
    %88 = vector.multi_reduction <maximumf>, %87, %cst_18 [0] : vector<16x128xf32> to vector<128xf32>
    %89 = vector.shape_cast %88 : vector<128xf32> to vector<1x128xf32>
    %90 = vector.broadcast %89 : vector<1x128xf32> to vector<16x128xf32>
    %91 = arith.subf %87, %90 : vector<16x128xf32>
    %92 = math.exp %91 : vector<16x128xf32>
    %cst_19 = arith.constant dense<0.000000e+00> : vector<128xf32>
    %93 = vector.multi_reduction <add>, %92, %cst_19 [0] : vector<16x128xf32> to vector<128xf32>
    %94 = vector.shape_cast %93 : vector<128xf32> to vector<1x128xf32>
    %95 = math.log %94 : vector<1x128xf32>
    %96 = arith.addf %89, %95 : vector<1x128xf32>
    %97 = vector.broadcast %73 : vector<1x128xi32> to vector<16x128xi32>
    %98 = arith.cmpi eq, %83, %97 : vector<16x128xi32>
    %cst_20 = arith.constant 0.000000e+00 : f32
    %99 = vector.broadcast %cst_20 : f32 to vector<16x128xf32>
    %100 = arith.select %98, %87, %99 : vector<16x128xi1>, vector<16x128xf32>
    %cst_21 = arith.constant dense<0.000000e+00> : vector<128xf32>
    %101 = vector.multi_reduction <add>, %100, %cst_21 [0] : vector<16x128xf32> to vector<128xf32>
    %102 = vector.shape_cast %101 : vector<128xf32> to vector<1x128xf32>
    %103 = arith.subf %96, %102 : vector<1x128xf32>
    %c0_22 = arith.constant 0 : index
    %c0_23 = arith.constant 0 : index
    %104 = vector.load %arg7[%c0_22, %c0_23] : memref<1x128xf32, #tpu.memory_space<vmem>>, vector<1x128xf32>
    %cst_24 = arith.constant 0.000000e+00 : f32
    %105 = vector.broadcast %cst_24 : f32 to vector<1x128xf32>
    %106 = arith.select %82, %103, %105 : vector<1x128xi1>, vector<1x128xf32>
    %107 = arith.addf %104, %106 : vector<1x128xf32>
    %c0_25 = arith.constant 0 : index
    %c0_26 = arith.constant 0 : index
    %108 = vector.load %arg7[%c0_25, %c0_26] : memref<1x128xf32, #tpu.memory_space<vmem>>, vector<1x128xf32>
    tpu.vector_store %arg7[%c0_25, %c0_26], %107 {strides = array<i32>} : memref<1x128xf32, #tpu.memory_space<vmem>>, vector<1x128xf32>,
    %c0_27 = arith.constant 0 : index
    %c0_28 = arith.constant 0 : index
    %109 = vector.load %arg8[%c0_27, %c0_28] : memref<1x128xf32, #tpu.memory_space<vmem>>, vector<1x128xf32>
    %110 = arith.extui %82 : vector<1x128xi1> to vector<1x128xi32>
    %111 = arith.sitofp %110 : vector<1x128xi32> to vector<1x128xf32>
    %112 = arith.addf %109, %111 : vector<1x128xf32>
    %c0_29 = arith.constant 0 : index
    %c0_30 = arith.constant 0 : index
    %113 = vector.load %arg8[%c0_29, %c0_30] : memref<1x128xf32, #tpu.memory_space<vmem>>, vector<1x128xf32>
    tpu.vector_store %arg8[%c0_29, %c0_30], %112 {strides = array<i32>} : memref<1x128xf32, #tpu.memory_space<vmem>>, vector<1x128xf32>,
    %c0_i32_31 = arith.constant 0 : i32
    %114 = arith.cmpi eq, %arg0, %c0_i32_31 : i32
    %115 = arith.extui %114 : i1 to i32
    %c0_i32_32 = arith.constant 0 : i32
    %116 = arith.cmpi ne, %115, %c0_i32_32 : i32
    scf.if %116 {
      %c0_33 = arith.constant 0 : index
      %c0_34 = arith.constant 0 : index
      %117 = vector.load %arg7[%c0_33, %c0_34] : memref<1x128xf32, #tpu.memory_space<vmem>>, vector<1x128xf32>
      %118 = vector.shape_cast %117 : vector<1x128xf32> to vector<1x1x128xf32>
      %cst_35 = arith.constant dense<0.000000e+00> : vector<1xf32>
      %119 = vector.multi_reduction <add>, %118, %cst_35 [1, 2] : vector<1x1x128xf32> to vector<1xf32>
      %120 = vector.shape_cast %119 : vector<1xf32> to vector<1x1x1xf32>
      %121 = vector.extract %120[0, 0, 0] : f32 from vector<1x1x1xf32>
      %c0_36 = arith.constant 0 : index
      %c0_37 = arith.constant 0 : index
      %122 = vector.load %arg8[%c0_36, %c0_37] : memref<1x128xf32, #tpu.memory_space<vmem>>, vector<1x128xf32>
      %123 = vector.shape_cast %122 : vector<1x128xf32> to vector<1x1x128xf32>
      %cst_38 = arith.constant dense<0.000000e+00> : vector<1xf32>
      %124 = vector.multi_reduction <add>, %123, %cst_38 [1, 2] : vector<1x1x128xf32> to vector<1xf32>
      %125 = vector.shape_cast %124 : vector<1xf32> to vector<1x1x1xf32>
      %126 = vector.extract %125[0, 0, 0] : f32 from vector<1x1x1xf32>
      %cst_39 = arith.constant 0.000000e+00 : f32
      %127 = arith.cmpf ogt, %126, %cst_39 : f32
      %128 = arith.divf %121, %126 : f32
      %cst_40 = arith.constant 0.000000e+00 : f32
      %129 = arith.select %127, %128, %cst_40 : f32
      %c0_41 = arith.constant 0 : index
      %c0_42 = arith.constant 0 : index
      %130 = memref.load %arg5[%c0_41, %c0_42] : memref<1x1xf32, #tpu.memory_space<smem>>
      memref.store %129, %arg5[%c0_41, %c0_42] : memref<1x1xf32, #tpu.memory_space<smem>>
      %c0_43 = arith.constant 0 : index
      %c0_44 = arith.constant 0 : index
      %131 = memref.load %arg6[%c0_43, %c0_44] : memref<1x1xf32, #tpu.memory_space<smem>>
      memref.store %126, %arg6[%c0_43, %c0_44] : memref<1x1xf32, #tpu.memory_space<smem>>
    } else {
    }
    return
  }
  func.func @transform_0(%arg0: i32) -> (i32, i32) {
    %c0_i32 = arith.constant 0 : i32
    %c0_i32_0 = arith.constant 0 : i32
    return %c0_i32, %arg0 : i32, i32
  }
  func.func @transform_1(%arg0: i32) -> (i32, i32) {
    %c0_i32 = arith.constant 0 : i32
    %c0_i32_0 = arith.constant 0 : i32
    %c0_i32_1 = arith.constant 0 : i32
    return %c0_i32, %c0_i32_0 : i32, i32
  }
  func.func @transform_2(%arg0: i32) -> (i32, i32) {
    %c0_i32 = arith.constant 0 : i32
    %c0_i32_0 = arith.constant 0 : i32
    %c0_i32_1 = arith.constant 0 : i32
    return %c0_i32, %c0_i32_0 : i32, i32
  }
  func.func @transform_3(%arg0: i32) -> (i32, i32) {
    %c0_i32 = arith.constant 0 : i32
    %c0_i32_0 = arith.constant 0 : i32
    return %c0_i32, %arg0 : i32, i32
  }
  func.func @transform_4(%arg0: i32) -> (i32, i32) {
    %c0_i32 = arith.constant 0 : i32
    %c0_i32_0 = arith.constant 0 : i32
    %c0_i32_1 = arith.constant 0 : i32
    return %c0_i32, %c0_i32_0 : i32, i32
  }
  func.func @transform_5(%arg0: i32) -> (i32, i32) {
    %c0_i32 = arith.constant 0 : i32
    %c0_i32_0 = arith.constant 0 : i32
    %c0_i32_1 = arith.constant 0 : i32
    return %c0_i32, %c0_i32_0 : i32, i32
  }
}

</mosaic_0001>

<bundles_post_ra>
// kernel: _ubr_class_loss_impl.1
= control target key start
LH: loop header
LB: loop body
LE: loop exit
PB: predicated region body
PF: predicated region fallthrough
CT: control target
= control target key end

     0   :  { %11 = vsyncpa [#allocation5], 0  ;;  %s317_s20 = smov 2   ;;  %v318_v1 = vmov 2   ;;  %s437_s0 = inlined_call_operand.vmem [shape: f32[4,128], index: 0, kind: input, shape index: {}]   ;;  %s438_s1 = inlined_call_operand.vmem [shape: f32[8,4], index: 1, kind: input, shape index: {}]   ;;  %s439_s2 = inlined_call_operand.vmem [shape: s32[8,1], index: 2, kind: input, shape index: {}]   ;;  %s440_s3 = inlined_call_operand.vmem [shape: f32[16,128], index: 3, kind: input, shape index: {}]   ;;  %s441_s4 = inlined_call_operand.hbm [shape: f32[1,1], index: 4, kind: output, shape index: {0}]   ;;  %s442_s5 = inlined_call_operand.hbm [shape: f32[1,1], index: 5, kind: output, shape index: {1}]  }
   0x1   :  { %v28_v0 = vld [vmem:[%s438_s1] sm:$0xff]  ;;  %277 = vset.pattern.permute.xlu1 %v318_v1 }
   0x2   :  { %82 = vrot.lane.b32.xlu0 %v28_v0, %s317_s20 }
   0x3   :  { %12 = vsyncpa [#allocation7], 0  ;;  %38 = vperm.xlu1 %277, %v28_v0   ;;  %v319_v2 = vmov 3   ;;  %v320_v3 = vmov 0   ;;  %v321_v4 = vmov 1   ;;  %s322_s21 = smov 127   ;;  %v32_v12 = vlaneseq }
   0x4   :  { %279 = vset.pattern.permute.xlu0 %v319_v2  ;;  %v29_v7 = vld [vmem:[%s439_s2] sm:$0xff]  ;;  %v323_v11 = vmov 0.0   ;;  %v31_v19 = vld [vmem:[%s440_s3 + $0x8] sm:$0xff]  ;;  %vm202_vm6 = vcmask 1040384   ;;  %s293_s30 = scalar_lea.hbm %s442_s5, 16 }
   0x5   :  { %v127_v8 = vcvt.s32.f32 %v29_v7  ;;  %25 = vst [vmem:[#allocation2] sm:$0x1] %v323_v11  ;;  %26 = vst [vmem:[#allocation3] sm:$0x1] %v323_v11  ;;  %v364_v13 = vshrl.u32 %v32_v12, 7  ;;  %v383_v24 = vld [vmem:[%s440_s3] sm:$0xff]  ;;  %p294_p0 = scmp.ne.s32.totalorder %s442_s5, %s293_s30  ;;  %p297_p1 = scmp.lt.u32.totalorder %s293_s30, %s442_s5 }
   0x6   :  { %v27_v17 = vld [vmem:[%s437_s0] sm:$0xf] }
   0x7   :  { %278 = vset.pattern.permute.xlu1 %v320_v3  ;;  %v367_v15 = vadd.s32 8, %v364_v13  ;;  %v34_v16 = vsub.s32 2, %v364_v13  ;;  %v44_v20 = vsub.s32 0, %v364_v13  ;;  %v64_v21 = vsub.s32 1, %v364_v13  ;;  %p299_p2 = pnand %p297_p1, %p294_p0 }
   0x8   :  { %47 = vperm.xlu1 %278, %v28_v0   ;;  %v55_v22 = vsub.s32 3, %v364_v13  ;;  %v75_v23 = vrot.slane %v27_v17, 6  ;;  %vm109_vm1 = vcmp.lt.s32.totalorder %v364_v13, 5 }
   0x9   :  { %vm151_vm0 = vcmp.lt.s32.totalorder %v367_v15, 12  ;;  %v35_v26 = vrot.slane %v27_v17, %v34_v16  ;;  %v45_v27 = vrot.slane %v27_v17, %v44_v20  ;;  %v65_v28 = vrot.slane %v27_v17, %v64_v21 }
   0xa   :  { %v385_v25 = vsel %vm151_vm0, %v31_v19, -1e+30  ;;  %v56_v29 = vrot.slane %v27_v17, %v55_v22  ;;  %v77_v30 = vsub.f32 %v27_v17, %v75_v23 }
   0xb   :  { %v154_v33 = vmax.f32 %v383_v24, %v385_v25 }
   0xc   :  { %280 = vset.pattern.permute.xlu1 %v321_v4  ;;  %v79_v38 = vrot.slane %v77_v30, 1  ;;  %v142_v4 = vand.u32 127, %v32_v12 }
   0xd   :  { %67 = vperm.xlu1 %280, %v28_v0   ;;  %v155_v39 = vrot.slane %v154_v33, 4 }
   0xe   :  { %v81_v42 = vmul.f32 %v79_v38, %v77_v30  ;;  %vm147_vm2 = vcmp.lt.s32.totalorder %v142_v4, 32 }
   0xf   :  { %v156_v43 = vmax.f32 %v154_v33, %v155_v39 }
  0x10   :  { %v94_v46 = vrot.slane %v81_v42, %v34_v16  ;;  %v193_v16 = vld [vmem:[#allocation3] sm:$0x1] }
  0x11   :  { %281 = vset.pattern.permute.xlu1 %v318_v1  ;;  %v157_v47 = vrot.slane %v156_v43, 2 }
  0x13   :  { %v158_v51 = vmax.f32 %v156_v43, %v157_v47 }
  0x15   :  { %v159_v53 = vrot.slane %v158_v51, 1 }
  0x17   :  { %v389_v54 = vmax.f32 %v158_v51, %v159_v53 }
  0x19   :  { %v161_v55 = vsub.f32 %v383_v24, %v389_v54  ;;  %v162_v57 = vsub.f32 %v385_v25, %v389_v54 }
  0x1b   :  { %v163_v60 = vmul.f32 1.442695, %v161_v55  ;;  %v165_v61 = vmul.f32 1.442695, %v162_v57 }
  0x74   :  { %v83_v5 = vpop.permute.xlu0 %82 }
  0x75   :  { %v85_v6 = vsub.f32 %v28_v0, %v83_v5 }
  0x77   :  { %87 = vrot.lane.b32.xlu0 %v85_v6, %s322_s21 }
  0x7b   :  { %58 = vperm.xlu0 %279, %v28_v0  }
  0x7f   :  { %282 = vset.pattern.permute.xlu0 %v320_v3 }
  0x80   :  { %130 = vperm.xlu0 %282, %v127_v8  }
  0x82   :  { %v39_v14 = vpop.permute.xlu1 %38 }
  0x83   :  { %v41_v34 = vmin.f32 %v35_v26, %v39_v14 }
  0x87   :  { %v48_v18 = vpop.permute.xlu1 %47 }
  0x88   :  { %v50_v35 = vmax.f32 %v45_v27, %v48_v18 }
  0x8a   :  { %v51_v40 = vsub.f32 %v41_v34, %v50_v35 }
  0x8c   :  { %v68_v31 = vpop.permute.xlu1 %67  ;;  %v52_v44 = vmax.f32 %v51_v40, 0.0 }
  0x8d   :  { %v70_v36 = vmax.f32 %v65_v28, %v68_v31 }
  0xe9   :  { %v88_v9 = vpop.permute.xlu0 %87 }
  0xea   :  { %v90_v10 = vmul.f32 %v88_v9, %v85_v6  ;;  %v117_v9 = vcvt.s32.f32 %v364_v13 }
  0xec   :  { %97 = vperm.xlu1 %281, %v90_v10  }
  0xfa   :  { %v59_v32 = vpop.permute.xlu0 %58 }
  0xfb   :  { %v61_v37 = vmin.f32 %v56_v29, %v59_v32 }
  0xfd   :  { %v71_v41 = vsub.f32 %v61_v37, %v70_v36 }
  0xff   :  { %v72_v45 = vmax.f32 %v71_v41, 0.0  ;;  %v131_v30 = vpop.permute.xlu0 %130 }
 0x101   :  { %v73_v49 = vmul.f32 %v72_v45, %v52_v44 }
 0x16b   :  { %v98_v48 = vpop.permute.xlu1 %97 }
 0x16c   :  { %v100_v50 = vadd.f32 %v98_v48, %v94_v46 }
 0x16e   :  { %v101_v52 = vsub.f32 %v100_v50, %v73_v49 }
 0x170   :  { %283 = vrcp.f32 %v101_v52 }
 0x171   :  { %285 = vpow2.f32 %v163_v60 }
 0x172   :  { %287 = vpow2.f32 %v165_v61 }
 0x17a   :  { %v284_v56 = vpop.eup %283 }
 0x17b   :  { %v103_v58 = vmul.f32 %v284_v56, %v101_v52  ;;  %v286_v6 = vpop.eup %285 }
 0x17c   :  { %v288_v7 = vpop.eup %287 }
 0x17d   :  { %v104_v59 = vsub.f32 2.0, %v103_v58  ;;  %v167_v14 = vadd.f32 %v288_v7, %v286_v6 }
 0x17f   :  { %v105_v62 = vmul.f32 %v284_v56, %v104_v59  ;;  %v168_v20 = vrot.slane %v167_v14, 4  ;;  %v189_v59 = vld [vmem:[#allocation2] sm:$0x1] }
 0x181   :  { %v106_v63 = vmul.f32 %v105_v62, %v73_v49  ;;  %v169_v26 = vadd.f32 %v168_v20, %v167_v14 }
 0x183   :  { %v110_v0 = vsel %vm109_vm1, %v106_v63, -1.0  ;;  %v170_v29 = vrot.slane %v169_v26, 2 }
 0x184   :  { %v111_v1 = vrot.slane %v110_v0, 4 }
 0x185   :  { %v171_v34 = vadd.f32 %v170_v29, %v169_v26 }
 0x186   :  { %v112_v2 = vmax.f32 %v110_v0, %v111_v1 }
 0x187   :  { %v172_v37 = vrot.slane %v171_v34, 1 }
 0x188   :  { %v113_v3 = vrot.slane %v112_v2, 2 }
 0x189   :  { %v173_v40 = vadd.f32 %v172_v37, %v171_v34 }
 0x18a   :  { %v114_v5 = vmax.f32 %v112_v2, %v113_v3 }
 0x18b   :  { %289 = vlog2.f32 %v173_v40 }
 0x18c   :  { %v115_v8 = vrot.slane %v114_v5, 1 }
 0x18e   :  { %v116_v10 = vmax.f32 %v114_v5, %v115_v8 }
 0x190   :  { %vm118_vm3 = vcmp.eq.f32.partialorder %v110_v0, %v116_v10  ;;  %vm146_vm4 = vcmp.gt.f32.partialorder %v116_v10, 0.3 }
 0x191   :  { %v119_v17 = vsel %vm118_vm3, %v117_v9, 8.0  ;;  %vm397_vm5 = vmand %vm146_vm4, %vm147_vm2 }
 0x192   :  { %v120_v19 = vrot.slane %v119_v17, 4  ;;  %v259_v12 = vsel %vm397_vm5, 1.0, %v323_v11 }
 0x193   :  { %v196_v21 = vadd.f32 %v259_v12, %v193_v16 }
 0x194   :  { %v121_v22 = vmin.f32 %v119_v17, %v120_v19 }
 0x195   :  { %197 = vst [vmem:[#allocation3] sm:$0x1] %v196_v21  ;;  %v290_v49 = vpop.eup %289 }
 0x196   :  { %v122_v23 = vrot.slane %v121_v22, 2  ;;  %v175_v51 = vmul.f32 0.6931472, %v290_v49 }
 0x198   :  { %v123_v27 = vmin.f32 %v121_v22, %v122_v23  ;;  %v176_v55 = vadd.f32 %v175_v51, %v389_v54 }
 0x19a   :  { %v124_v28 = vrot.slane %v123_v27, 1 }
 0x19c   :  { %v125_v31 = vmin.f32 %v123_v27, %v124_v28  ;;  %v213_v32 = vld [vmem:[#allocation3] sm:$0x1] }
 0x19d   :  { %v214_v33 = vsel %vm202_vm6, %v213_v32, 0.0 }
 0x19e   :  { %vm126_vm7 = vcmp.eq.f32.partialorder %v117_v9, %v125_v31  ;;  %215 = vadd.xlane.f32.xlu0 %v214_v33 }
 0x19f   :  { %v133_v35 = vsel %vm126_vm7, %v131_v30, 0.0 }
 0x1a0   :  { %v134_v11 = vrot.slane %v133_v35, 4 }
 0x1a2   :  { %v135_v36 = vadd.f32 %v134_v11, %v133_v35 }
 0x1a4   :  { %v136_v38 = vrot.slane %v135_v36, 2 }
 0x1a6   :  { %v137_v39 = vadd.f32 %v136_v38, %v135_v36 }
 0x1a8   :  { %v138_v41 = vrot.slane %v137_v39, 1 }
 0x1aa   :  { %v139_v42 = vadd.f32 %v138_v41, %v137_v39 }
 0x1ac   :  { %v260_v43 = vtrunc.f32 %v139_v42 }
 0x1ae   :  { %v261_v44 = vcvt.f32.s32 %v260_v43 }
 0x1b0   :  { %vm177_vm8 = vcmp.eq.s32.totalorder %v364_v13, %v261_v44  ;;  %vm178_vm9 = vcmp.eq.s32.totalorder %v367_v15, %v261_v44 }
 0x1b1   :  { %v179_v45 = vsel %vm177_vm8, %v383_v24, 0.0  ;;  %v180_v46 = vsel %vm178_vm9, %v385_v25, 0.0 }
 0x1b2   :  { %v181_v47 = vadd.f32 %v180_v46, %v179_v45 }
 0x1b4   :  { %v182_v48 = vrot.slane %v181_v47, 4 }
 0x1b6   :  { %v183_v50 = vadd.f32 %v182_v48, %v181_v47 }
 0x1b8   :  { %v184_v52 = vrot.slane %v183_v50, 2 }
 0x1ba   :  { %v185_v53 = vadd.f32 %v184_v52, %v183_v50 }
 0x1bc   :  { %v186_v56 = vrot.slane %v185_v53, 1 }
 0x1be   :  { %v187_v57 = vadd.f32 %v186_v56, %v185_v53 }
 0x1c0   :  { %v188_v58 = vsub.f32 %v176_v55, %v187_v57 }
 0x1c2   :  { %v190_v13 = vsel %vm397_vm5, %v188_v58, 0.0 }
 0x1c3   :  { %v191_v15 = vadd.f32 %v190_v13, %v189_v59 }
 0x1c5   :  { %192 = vst [vmem:[#allocation2] sm:$0x1] %v191_v15 }
 0x1cc   :  { %v201_v24 = vld [vmem:[#allocation2] sm:$0x1] }
 0x1cd   :  { %v203_v25 = vsel %vm202_vm6, %v201_v24, 0.0 }
 0x1ce   :  { %204 = vadd.xlane.f32.xlu1 %v203_v25 }
 0x22b   :  { %v216_v60 = vpop.xlane.xlu0 %215 }
 0x22c   :  { %v217_v61 = vrot.slane %v216_v60, 4 }
 0x22e   :  { %v218_v62 = vadd.f32 %v217_v61, %v216_v60 }
 0x230   :  { %v219_v63 = vrot.slane %v218_v62, 2 }
 0x232   :  { %v220_v2 = vadd.f32 %v219_v63, %v218_v62 }
 0x234   :  { %v221_v5 = vrot.slane %v220_v2, 1 }
 0x236   :  { %v222_v8 = vadd.f32 %v221_v5, %v220_v2 }
 0x25b   :  { %v205_v0 = vpop.xlane.xlu1 %204 }
 0x25c   :  { %v206_v1 = vrot.slane %v205_v0, 4 }
 0x25e   :  { %v207_v54 = vadd.f32 %v206_v1, %v205_v0 }
 0x260   :  { %v208_v3 = vrot.slane %v207_v54, 2 }
 0x262   :  { %v209_v4 = vadd.f32 %v208_v3, %v207_v54 }
 0x264   :  { %v210_v6 = vrot.slane %v209_v4, 1 }
 0x266   :  { %v211_v7 = vadd.f32 %v210_v6, %v209_v4 }
 0x268   :  { %262 = vpush %v211_v7 }
 0x269   :  { %264 = vpush %v222_v8 }
 0x299   :  { %s263_s0 = spop %262 }
 0x29a   :  { %s265_s3 = spop %264 }
 0x29b   :  { %v225_v9 = vstv %s265_s3  ;;  %233 = sst [smem:[#allocation6]] %s265_s3 }
 0x29c   :  { %291 = vrcp.f32 %v225_v9 }
 0x29d   :  { %302 = shalt.err (!%p299_p2)
}
 0x29e   :  { %s324_s10 = smov [#allocation6]   ;;  %p224_p3 = scmp.gt.f32.partialorder %s265_s3, 0.0 }
 0x29f   :  { %249 = dma.smem_to_hbm %s324_s10, 16, %s442_s5, [#allocation7]  }
 0x2a0   :  { %s303_s17 = scalar_lea.hbm %s441_s4, 16 }
 0x2a1   :  { %p304_p4 = scmp.ne.s32.totalorder %s441_s4, %s303_s17  ;;  %p307_p5 = scmp.lt.u32.totalorder %s303_s17, %s441_s4 }
 0x2a3   :  { %p309_p6 = pnand %p307_p5, %p304_p4 }
 0x2a6   :  { %v292_v10 = vpop.eup %291 }
 0x2a7   :  { %266 = vpush %v292_v10 }
 0x2d8   :  { %s267_s13 = spop %266 }
 0x2d9   :  { %s228_s14 = smul.f32 %s267_s13, %s263_s0 }
 0x2db   :  { %s446_s14 = smov (!%p224_p3, %s228_s14), 0.0 }
 0x2dc   :  { %231 = sst [smem:[#allocation4]] %s446_s14 }
 0x2dd   :  { %312 = shalt.err (!%p309_p6)
}
 0x2de   :  { %s325_s5 = smov [#allocation4]  }
 0x2df   :  { %241 = dma.smem_to_hbm %s325_s5, 16, %s441_s4, [#allocation5]  }
 0x2e0   :  { %313 = dma.done.wait [#allocation5], 16  }
 0x2e1   :  { %314 = vsyncadd [#allocation5], 4294967280 }
 0x2e2   :  { %315 = dma.done.wait [#allocation7], 16  }
 0x2e3   :  { %316 = vsyncadd [#allocation7], 4294967280 }
 0x2e4   :  { %256 = sfence }
 0x2e5   :  { %257 = vsyncpa [#allocation5], 1 }
 0x2e6   :  { %258 = vsyncpa [#allocation7], 1 }

</bundles_post_ra>
